<compile_context>
chip_gen: v6e
topology: v6e:2x2x1
jax: 0.10.0
libtpu: 0.0.40
codegen_flags: <defaults>
</compile_context>

<pallas_src>
import jax
import jax.numpy as jnp
from jax.experimental import pallas as pl
from jax.experimental.pallas import tpu as pltpu

D_IN = 64
D_OUT = 64


# ----------------------------------------------------------------------------
# Pallas kernel
# ----------------------------------------------------------------------------
def _linear_kernel(x_ref, wt_ref, o_ref):
    # x_ref : (TM, D_IN)   row tile of the flattened input
    # wt_ref: (D_IN, D_OUT) == W.T  (shared across all grid steps)
    # o_ref : (TM, D_OUT)
    o_ref[...] = jnp.dot(
        x_ref[...], wt_ref[...], preferred_element_type=jnp.float32
    ).astype(o_ref.dtype)


# ----------------------------------------------------------------------------
# Wrapper
# ----------------------------------------------------------------------------
def encoder_to_decoder_forward(x, w, *, tile_m=8):
    """Forward of Encoder_to_Decoder.

    x: (..., 64) float input.
    w: (64, 64) weight in the PyTorch nn.Linear layout (out_features, in_features).
    Returns x @ w.T with the original leading shape.
    """
    assert tile_m % 8 == 0, "row tile must be sublane-aligned"
    orig_lead = x.shape[:-1]
    x2 = x.reshape(-1, D_IN).astype(jnp.float32)
    M = x2.shape[0]

    # Pad rows to a multiple of the tile (keeps the BlockSpec sublane-aligned).
    Mp = ((M + tile_m - 1) // tile_m) * tile_m
    if Mp != M:
        x2 = jnp.pad(x2, ((0, Mp - M), (0, 0)))

    wt = jnp.asarray(w, jnp.float32).T  # (in, out): y = x @ W.T

    out = pl.pallas_call(
        _linear_kernel,
        out_shape=jax.ShapeDtypeStruct((Mp, D_OUT), jnp.float32),
        grid=(Mp // tile_m,),
        in_specs=[
            pl.BlockSpec((tile_m, D_IN), lambda i: (i, 0)),   # row tile of x
            pl.BlockSpec((D_IN, D_OUT), lambda i: (0, 0)),    # full weight, reused
        ],
        out_specs=pl.BlockSpec((tile_m, D_OUT), lambda i: (i, 0)),
        compiler_params=pltpu.CompilerParams(
            dimension_semantics=("parallel",)),  # shards row tiles across TCs on v7x
    )(x2, wt)

    if Mp != M:
        out = out[:M]
    return out.reshape(*orig_lead, D_OUT)


# ----------------------------------------------------------------------------
# Deterministic example / self-check
# ----------------------------------------------------------------------------
if __name__ == "__main__":
    key = jax.random.PRNGKey(0)
    kx, kw = jax.random.split(key)

    B, T = 2, 8                      # small shapes; feature dim fixed at 64 by the module
    x = jax.random.normal(kx, (B, T, D_IN), jnp.float32)
    # nn.Linear(64, 64, bias=False) weight, torch layout (out_features, in_features)
    w = jax.random.normal(kw, (D_OUT, D_IN), jnp.float32) / jnp.sqrt(D_IN)

    out = encoder_to_decoder_forward(x, w)
    jax.block_until_ready(out)

    # Correctness vs plain-JAX reference of the PyTorch forward: y = x @ W.T
    ref = (x.reshape(-1, D_IN) @ w.T).reshape(B, T, D_OUT)
    assert out.shape == (B, T, D_OUT)
    assert jnp.allclose(out, ref, atol=1e-5, rtol=1e-5)

    print("KERNEL_OK")
</pallas_src>

<mosaic_0001>
module attributes {stable_mosaic.version = 11 : i64} {
  func.func @_linear_kernel(%arg0: i32, %arg1: memref<8x64xf32, #tpu.memory_space<vmem>>, %arg2: memref<64x64xf32, #tpu.memory_space<vmem>>, %arg3: memref<8x64xf32, #tpu.memory_space<vmem>>) attributes {dimension_semantics = [#tpu.dimension_semantics<parallel>], iteration_bounds = array<i64: 2>, scalar_prefetch = 0 : i64, scratch_operands = 0 : i64, tpu.core_type = #tpu.core_type<tc>, window_params = [{transform_indices = @transform_0, window_bounds = array<i64: 8, 64>}, {pipeline_mode = #tpu.pipeline_mode<synchronous>, transform_indices = @transform_1, window_bounds = array<i64: 64, 64>}, {transform_indices = @transform_2, window_bounds = array<i64: 8, 64>}]} {
    %c0 = arith.constant 0 : index
    %c0_0 = arith.constant 0 : index
    %0 = vector.load %arg1[%c0, %c0_0] : memref<8x64xf32, #tpu.memory_space<vmem>>, vector<8x64xf32>
    %c0_1 = arith.constant 0 : index
    %c0_2 = arith.constant 0 : index
    %1 = vector.load %arg2[%c0_1, %c0_2] : memref<64x64xf32, #tpu.memory_space<vmem>>, vector<64x64xf32>
    %cst = arith.constant dense<0.000000e+00> : vector<8x64xf32>
    %2 = tpu.matmul %0, %1, %cst {dimension_numbers = #tpu.dot_dimension_numbers<[1], [0], [0], [1], [0, 0, 1, 1], [], []>} : vector<8x64xf32>, vector<64x64xf32>, vector<8x64xf32> -> vector<8x64xf32>
    %c0_3 = arith.constant 0 : index
    %c0_4 = arith.constant 0 : index
    %3 = vector.load %arg3[%c0_3, %c0_4] : memref<8x64xf32, #tpu.memory_space<vmem>>, vector<8x64xf32>
    tpu.vector_store %arg3[%c0_3, %c0_4], %2 {strides = array<i32>} : memref<8x64xf32, #tpu.memory_space<vmem>>, vector<8x64xf32>,
    return
  }
  func.func @transform_0(%arg0: i32) -> (i32, i32) {
    %c0_i32 = arith.constant 0 : i32
    %c0_i32_0 = arith.constant 0 : i32
    return %arg0, %c0_i32 : i32, i32
  }
  func.func @transform_1(%arg0: i32) -> (i32, i32) {
    %c0_i32 = arith.constant 0 : i32
    %c0_i32_0 = arith.constant 0 : i32
    %c0_i32_1 = arith.constant 0 : i32
    return %c0_i32, %c0_i32_0 : i32, i32
  }
  func.func @transform_2(%arg0: i32) -> (i32, i32) {
    %c0_i32 = arith.constant 0 : i32
    %c0_i32_0 = arith.constant 0 : i32
    return %arg0, %c0_i32 : i32, i32
  }
}

</mosaic_0001>

<bundles_post_ra>
// kernel: tpu_custom_call.1
= control target key start
LH: loop header
LB: loop body
LE: loop exit
PB: predicated region body
PF: predicated region fallthrough
CT: control target
= control target key end

     0   :  { %7 = vsyncpa [#allocation3], 0  ;;  %s772_s0 = inlined_call_operand.hbm [shape: f32[16,64], index: 0, kind: input, shape index: {}]   ;;  %s773_s1 = inlined_call_operand.hbm [shape: f32[64,64], index: 1, kind: input, shape index: {}]   ;;  %s774_s2 = inlined_call_operand.hbm [shape: f32[16,64], index: 2, kind: output, shape index: {}]  }
   0x1   :  { %9 = vsyncpa [#allocation3 + $0x1], 0 }
   0x2   :  { %10 = vsyncpa [#allocation6], 0 }
   0x3   :  { %11 = vsyncpa [#allocation4], 0 }
   0x4   :  { %13 = vsyncpa [#allocation4 + $0x1], 0  ;;  %s602_s9 = smov 0   ;;  %s604_s10 = smov 0  }
   0x5   :  { %s606_s11 = smov 0   ;;  %s608_s12 = smov 0  }
   0x6 LB: > { %s623_s13 = sadd.s32 4294967295, %s578_s12   ;;  %s352_s14 = sadd.s32 4294967294, %s578_s12   ;;  %s578_s12 = sphi %s608_s12, %s796_s12   ;;  %s574_s11 = sphi %s606_s11, %s795_s11   ;;  %s570_s10 = sphi %s604_s10, %s794_s10   ;;  %s566_s9 = sphi %s602_s9, %s793_s9  }
   0x7   : > { %p39_p0 = scmp.ne.s32.totalorder %s570_s10, %s566_s9  ;;  %p775_p1 = scmp.eq.s32.totalorder %s623_s13, 0 }
   0x8   : > { %p90_p3 = scmp.eq.s32.totalorder %s352_s14, 1  ;;  %p353_p5 = scmp.ge.s32.totalorder %s578_s12, 1 }
   0x9   : > { %p632_p4 = por %p775_p1, %p39_p0  ;;  %p97_p7 = scmp.lt.s32.totalorder %s578_s12, 3 }
   0xa   : > { %p637_p6 = por %p90_p3, %p39_p0  ;;  %s580_s18 = smov [#allocation5]  }
   0xb   : > { %s779_s15 = scalar_select %p632_p4, 1, 0 }
   0xc   : > { %s780_s16 = scalar_select %p637_p6, 1, 0 }
   0xd   : > { %p642_p8 = pnand %p353_p5, %p97_p7  ;;  %s109_s19 = sshll.u32 %s580_s18, 4  ;;  %s110_s19 = int_to_ptr.vmem [resolvable:$true] %s109_s19 }
   0xe   : > { %s656_s21 = sadd.s32 1, %s578_s12   ;;  %s26_s22 = sadd.s32 1, %s574_s11 }
   0xf   : > { %s781_s17 = scalar_select %p642_p8, 1, 0 }
  0x10   : > { %p403_p9 = pneg %p642_p8  ;;  %s23_s23 = ssub.s32 %s578_s12, %s656_s21 }
  0x11   : > { %s467_s24 = scalar_lea.vmem %s110_s19, 1024  ;;  %p475_p5 = scmp.lt.s32.totalorder %s110_s19, %s110_s19 }
  0x12   : > { %p651_p11 = pnand %p403_p9, %p775_p1  ;;  %p468_p13 = scmp.ne.s32.totalorder %s110_s19, %s467_s24 }
  0x13   : > { %p476_p7 = scmp.lt.s32.totalorder %s467_s24, %s467_s24 }
  0x14   : > { %p458_p12 = pneg %p651_p11 }
  0x15   : > { %p477_p10 = por %p476_p7, %p475_p5 }
  0x16   : > { %p470_p0 = pnand %p468_p13, %p458_p12 }
  0x18   : > { %p471_p3 = pneg %p470_p0 }
  0x1a   : > { %p478_p2 = pnand %p477_p10, %p471_p3 }
  0x1c   : > { %481 = shalt.err (!%p478_p2)
}
  0x1d   : > { %s581_s25 = smov 128   ;;  %s582_s26 = smov 8  }
  0x1e   : > { %406 = dma.hbm_to_vmem [thread:$0]  (!%p651_p11), %s773_s1, 1024, %s110_s19, [#allocation6], %s581_s25, %s581_s25, %s582_s26  }
  0x1f   : > { %p24_p9 = scmp.eq.s32.totalorder %s23_s23, 0  ;;  %p33_p12 = scmp.ne.s32.totalorder %s574_s11, %s570_s10 }
  0x20   : > { %p34_p10 = scmp.eq.s32.totalorder %s578_s12, 0  ;;  %p416_p2 = scmp.lt.s32.totalorder %s578_s12, 2 }
  0x21   : > { %s673_s29 = scalar_select %p24_p9, %s574_s11, %s26_s22  }
  0x22   : > { %p35_p13 = por %p34_p10, %p33_p12  ;;  %p783_p0 = scmp.eq.s32.totalorder %s623_s13, 1 }
  0x23   : > { %s123_s3 = sand.u32 1, %s574_s11   ;;  %s357_s4 = sshll.u32 %s578_s12, 7 }
  0x24   : > { %p677_p3 = por %p783_p0, %p33_p12  ;;  %s356_s5 = sshll.u32 %s123_s3, 3 }
  0x25   : > { %s686_s8 = scalar_lea.hbm %s772_s0, %s357_s4  ;;  %s127_s14 = scalar_lea.vmem [#allocation2], %s356_s5 }
  0x26   : > { %s784_s30 = scalar_select %p677_p3, 1, 0 }
  0x27   : > { %s134_s18 = sshll.u32 %s127_s14, 4  ;;  %p688_p11 = pnand %p416_p2, %p35_p13  ;;  %s135_s18 = int_to_ptr.vmem [resolvable:$true] %s134_s18 }
  0x28   : > { %s124_s20 = scalar_lea.sflag [#allocation3], %s123_s3  ;;  %s482_s22 = scalar_lea.hbm %s686_s8, 128 }
  0x29   : > { %p483_p5 = scmp.ne.s32.totalorder %s686_s8, %s482_s22  ;;  %p484_p7 = pneg %p688_p11 }
  0x2a   : > { %s487_s25 = scalar_lea.hbm %s772_s0, 256  ;;  %p488_p10 = scmp.lt.s32.totalorder %s686_s8, %s772_s0 }
  0x2b   : > { %p485_p9 = pnand %p484_p7, %p483_p5  ;;  %p489_p2 = scmp.lt.s32.totalorder %s487_s25, %s482_s22 }
  0x2d   : > { %p486_p12 = pneg %p485_p9  ;;  %p490_p13 = por %p489_p2, %p488_p10 }
  0x2f   : > { %p491_p0 = pnand %p490_p13, %p486_p12 }
  0x31   : > { %494 = shalt.err (!%p491_p0)
}
  0x32   : > { %s495_s28 = scalar_lea.vmem %s135_s18, 128  ;;  %s583_s3 = smov [#allocation2]  }
  0x33   : > { %p496_p1 = scmp.ne.s32.totalorder %s135_s18, %s495_s28  ;;  %s500_s4 = sshll.u32 %s583_s3, 4  ;;  %s501_s4 = int_to_ptr.vmem [resolvable:$false] %s500_s4 }
  0x34   : > { %s502_s5 = scalar_lea.vmem %s501_s4, 256  ;;  %p503_p5 = scmp.lt.s32.totalorder %s135_s18, %s501_s4 }
  0x35   : > { %p498_p6 = pnand %p496_p1, %p484_p7  ;;  %p504_p9 = scmp.lt.s32.totalorder %s502_s5, %s495_s28 }
  0x37   : > { %p499_p3 = pneg %p498_p6  ;;  %p505_p4 = por %p504_p9, %p503_p5 }
  0x39   : > { %p506_p8 = pnand %p505_p4, %p499_p3 }
  0x3b   : > { %509 = shalt.err (!%p506_p8)
}
  0x3c   : > { %410 = dma.hbm_to_vmem [thread:$0]  (!%p688_p11), %s686_s8, 128, %s135_s18, %s124_s20  }
  0x3d   : > { %p786_p12 = scmp.ne.s32.totalorder %s781_s17, 0 }
  0x3e   : > { %s709_s6 = sand.u32 (!%p786_p12), 1, %s570_s10   ;;  %p787_p1 = scmp.ne.s32.totalorder (!%p786_p12), %s779_s15, 0 }
  0x3f   : > { %143 = sbr.rel (%p786_p12) target bundleno = 296 (0x128), region = 28  ;;  %s359_s7 = sshll.u32 (!%p786_p12), %s709_s6, 3 }
  0x40   : > { %s146_s14 = scalar_lea.sflag (!%p786_p12), [#allocation3], %s709_s6  ;;  %s149_s22 = scalar_lea.vmem (!%p786_p12), [#allocation2], %s359_s7 }
  0x44   : > { %553 = dma.done.wait (%p787_p1), %s146_s14, 128  }
  0x45   : > { %555 = vsyncadd (%p787_p1), %s146_s14, 4294967168  ;;  %p788_p4 = scmp.eq.s32.totalorder %s623_s13, 0 }
  0x47   : > { %557 = dma.done.wait (%p788_p4), [#allocation6], 1024   ;;  %p789_p6 = pmov %p788_p4 }
  0x48   : > { %v584_v0 = vmov 0.0   ;;  %vm585_vm0 = vmmov 0   ;;  %v182_v1 = vld [vmem:[#allocation5 + $0x38] sm:$0xff]  ;;  %v181_v2 = vld [vmem:[#allocation5 + $0x30] sm:$0xff]  ;;  %v180_v3 = vld [vmem:[#allocation5 + $0x28] sm:$0xff]  ;;  %vm183_vm1 = vcmask 523264  }
  0x49   : > { %559 = vsyncadd (%p789_p6), [#allocation6], 4294966272  ;;  %376 = vmatprep.subr.mxu0 %v584_v0  ;;  %392 = vmatprep.mubr.msk.f32.mxu0 %vm585_vm0, %v584_v0  ;;  %v179_v4 = vld [vmem:[#allocation5 + $0x20] sm:$0xff]  ;;  %v178_v5 = vld [vmem:[#allocation5 + $0x18] sm:$0xff]  ;;  %s364_s15 = sshll.u32 %s623_s13, 7  ;;  %s173_s17 = scalar_lea.vmem [#allocation7], %s359_s7 }
  0x4a   : > { %377 = vmatpush3.msra.mxu0 %v182_v1  ;;  %v177_v6 = vld [vmem:[#allocation5 + $0x10] sm:$0xff]  ;;  %v176_v7 = vld [vmem:[#allocation5 + $0x8] sm:$0xff]  ;;  %v175_v8 = vld [vmem:[#allocation5] sm:$0xff]  ;;  %s272_s8 = sshll.u32 %s173_s17, 4  ;;  %s729_s20 = scalar_lea.hbm %s774_s2, %s364_s15  ;;  %s731_s8 = int_to_ptr.vmem [resolvable:$true] %s272_s8 }
  0x4b   : > { %378 = vmatprep.subr.mxu0 %v584_v0  ;;  %v174_v9 = vld [vmem:[%s149_s22] sm:$0xff]  ;;  %s259_s23 = scalar_lea.sflag [#allocation4], %s709_s6  ;;  %s510_s24 = scalar_lea.vmem %s731_s8, 128 }
  0x4c   : > { %379 = vmatpush3.msra.mxu0 %v181_v2  ;;  %p511_p8 = scmp.ne.s32.totalorder %s731_s8, %s510_s24  ;;  %p790_p3 = scmp.ne.s32.totalorder %s784_s30, 0 }
  0x4d   : > { %380 = vmatprep.subr.mxu0 %v584_v0  ;;  %s586_s13 = smov [#allocation7]  }
  0x4e   : > { %381 = vmatpush3.msra.mxu0 %v180_v3  ;;  %p512_p11 = pnand %p511_p8, %p790_p3  ;;  %s514_s25 = sshll.u32 %s586_s13, 4  ;;  %s515_s25 = int_to_ptr.vmem [resolvable:$false] %s514_s25 }
  0x4f   : > { %382 = vmatprep.subr.mxu0 %v584_v0  ;;  %s516_s26 = scalar_lea.vmem %s515_s25, 256  ;;  %p517_p10 = scmp.lt.s32.totalorder %s731_s8, %s515_s25 }
  0x50   : > { %383 = vmatpush3.msra.mxu0 %v179_v4  ;;  %p513_p7 = pneg %p512_p11  ;;  %p518_p2 = scmp.lt.s32.totalorder %s516_s26, %s510_s24 }
  0x51   : > { %384 = vmatprep.subr.mxu0 %v584_v0 }
  0x52   : > { %385 = vmatpush3.msra.mxu0 %v178_v5  ;;  %p519_p13 = por %p518_p2, %p517_p10 }
  0x53   : > { %386 = vmatprep.subr.mxu0 %v584_v0 }
  0x54   : > { %387 = vmatpush3.msra.mxu0 %v177_v6  ;;  %p520_p0 = pnand %p519_p13, %p513_p7 }
  0x55   : > { %388 = vmatprep.subr.mxu0 %v584_v0 }
  0x56   : > { %389 = vmatpush3.msra.mxu0 %v176_v7 }
  0x57   : > { %390 = vmatprep.subr.mxu0 %v584_v0 }
  0x58   : > { %391 = vmatpush3.msra.mxu0 %v175_v8 }
  0x59   : > { %393 = vmatmul.mubr.msk.f32.vlgmr.msra.gmra.mxu0 %vm183_vm1, %v174_v9 }
 0x119   : > { %v253_v10 = vpop.f32.mrf.mxu0 }
 0x11a   : > { %257 = vst.msk [vmem:[%s173_s17] sm:$0xff] %vm183_vm1, %v253_v10 }
 0x11b   : > { %v394_v11 = vpop.f32.mrf.mxu0 }
 0x11c   : > { %523 = shalt.err (!%p520_p0)
}
 0x11d   : > { %s524_s27 = scalar_lea.hbm %s729_s20, 128  ;;  %s528_s4 = scalar_lea.hbm %s774_s2, 256 }
 0x11e   : > { %p525_p5 = scmp.ne.s32.totalorder %s729_s20, %s524_s27  ;;  %p529_p1 = scmp.lt.s32.totalorder %s729_s20, %s774_s2 }
 0x11f   : > { %p530_p4 = scmp.lt.s32.totalorder %s528_s4, %s524_s27 }
 0x120   : > { %p526_p9 = pnand %p525_p5, %p790_p3 }
 0x121   : > { %p531_p6 = por %p530_p4, %p529_p1 }
 0x122   : > { %p527_p12 = pneg %p526_p9 }
 0x124   : > { %p532_p8 = pnand %p531_p6, %p527_p12 }
 0x126   : > { %535 = shalt.err (!%p532_p8)
}
 0x127   : > { %401 = dma.vmem_to_hbm [thread:$0]  (%p790_p3), %s731_s8, 128, %s729_s20, %s259_s23  }
 0x128 PF: > { %s284_s7 = sand.u32 1, %s566_s9   ;;  %p791_p11 = scmp.ne.s32.totalorder %s780_s16, 0 }
 0x129   : > { %p792_p7 = scmp.ge.s32.totalorder %s578_s12, 2  ;;  %s285_s14 = scalar_lea.sflag [#allocation4], %s284_s7 }
 0x12b   : > { %p412_p10 = pnand %p792_p7, %p791_p11 }
 0x12d   : > { %p413_p2 = pneg %p412_p10 }
 0x12f   : > { %561 = dma.done.wait (%p413_p2), %s285_s14, 128  }
 0x130   : > { %563 = vsyncadd (%p413_p2), %s285_s14, 4294967168  ;;  %p16_p13 = scmp.ge.s32.totalorder %s656_s21, 4   ;;  %s793_s9 = smov %s570_s10 }
 0x131   : > { %s794_s10 = smov %s574_s11  ;;  %s795_s11 = smov %s673_s29 }
 0x132   : > { %s796_s12 = smov %s656_s21  ;;  %18 = sbr.rel (!%p16_p13) target bundleno = 6 (0x6), region = 77 }
 0x137   :  { %290 = vsyncpa [#allocation3], 1 }
 0x138   :  { %292 = vsyncpa [#allocation3 + $0x1], 1 }
 0x139   :  { %293 = vsyncpa [#allocation6], 1 }
 0x13a   :  { %294 = vsyncpa [#allocation4], 1 }
 0x13b   :  { %296 = vsyncpa [#allocation4 + $0x1], 1 }

</bundles_post_ra>
